<compile_context>
chip_gen: v6e
topology: v6e:2x2x1
jax: 0.10.0
libtpu: 0.0.40
codegen_flags: <defaults>
</compile_context>

<pallas_src>
import jax
import jax.numpy as jnp
from jax.experimental import pallas as pl
from jax.experimental.pallas import tpu as pltpu

Z_DIM = 512
K_DIM = 8            # 512 / 64
N_CLASSES = 48
HIDDEN_SIZE = 64
N_LANES = 128        # lane-dense (padded) output width


def _hyper_kernel(z_ref, w_ref, b_ref, h_ref):
    # VPU outer-product accumulation: h = b + sum_k z[:, k] (x) w[k, :]
    z = z_ref[...]                    # (TM, 8)
    w = w_ref[...]                    # (8, 128)  zero-padded past column 47
    b = b_ref[...]                    # (1, 128)
    acc = z[:, 0:1] * w[0:1, :] + b   # (TM, 128)
    for k in range(1, K_DIM):         # fully unrolled; broadcasts emitted once
        acc = acc + z[:, k:k + 1] * w[k:k + 1, :]
    h_ref[...] = acc


def _hyper_matmul_padded(z2d, w1, b1):
    """z2d: (M, 8) f32, w1: (8, 48), b1: (48,)  ->  (M, 48) f32."""
    M = z2d.shape[0]
    TM = 256 if (M % 256 == 0) else M          # M is always a multiple of 64
    grid = (M // TM,)

    # Lane-dense padding of the N axis (48 -> 128) at trace time.
    w_pad = jnp.pad(w1, ((0, 0), (0, N_LANES - N_CLASSES)))
    b_pad = jnp.pad(b1.reshape(1, N_CLASSES), ((0, 0), (0, N_LANES - N_CLASSES)))

    cost = pl.CostEstimate(
        flops=2 * M * N_CLASSES * K_DIM,
        transcendentals=0,
        bytes_accessed=4 * (M * K_DIM + K_DIM * N_CLASSES + N_CLASSES + M * N_CLASSES),
    )

    h_pad = pl.pallas_call(
        _hyper_kernel,
        out_shape=jax.ShapeDtypeStruct((M, N_LANES), jnp.float32),
        grid=grid,
        in_specs=[
            pl.BlockSpec((TM, K_DIM), lambda i: (i, 0),
                         memory_space=pltpu.MemorySpace.VMEM),
            pl.BlockSpec((K_DIM, N_LANES), lambda i: (0, 0),
                         memory_space=pltpu.MemorySpace.VMEM),
            pl.BlockSpec((1, N_LANES), lambda i: (0, 0),
                         memory_space=pltpu.MemorySpace.VMEM),
        ],
        out_specs=pl.BlockSpec((TM, N_LANES), lambda i: (i, 0),
                               memory_space=pltpu.MemorySpace.VMEM),
        compiler_params=pltpu.CompilerParams(
            dimension_semantics=("parallel",)),
        cost_estimate=cost,
    )(z2d, w_pad, b_pad)

    return h_pad[:, :N_CLASSES]


def hypernetwork1_forward(z, w1, b1):
    """Original module semantics. z: (512,) -> kernel: (48, 64)."""
    h1 = _hyper_matmul_padded(z.reshape(HIDDEN_SIZE, K_DIM), w1, b1)  # (64, 48)
    return h1.reshape(N_CLASSES, HIDDEN_SIZE)                         # row-major view


def hypernetwork1_forward_batched(zs, w1, b1):
    """Batched: zs (B, 512) -> (B, 48, 64). Amortizes launch/grid-step overhead."""
    B = zs.shape[0]
    h = _hyper_matmul_padded(zs.reshape(B * HIDDEN_SIZE, K_DIM), w1, b1)  # (B*64, 48)
    return h.reshape(B, N_CLASSES, HIDDEN_SIZE)


def _reference(z, w1, b1):
    h1 = jnp.dot(z.reshape(HIDDEN_SIZE, K_DIM), w1,
                 precision=jax.lax.Precision.HIGHEST) + b1
    return h1.reshape(N_CLASSES, HIDDEN_SIZE)


if __name__ == "__main__":
    key = jax.random.PRNGKey(0)
    kz, kw, kb, kzb = jax.random.split(key, 4)

    # Deterministic params mimicking torch.fmod(torch.randn(...), 2).
    w1 = jnp.fmod(jax.random.normal(kw, (K_DIM, N_CLASSES), dtype=jnp.float32), 2.0)
    b1 = jnp.fmod(jax.random.normal(kb, (N_CLASSES,), dtype=jnp.float32), 2.0)

    # --- single-z path (original module semantics) ---
    z = jax.random.normal(kz, (Z_DIM,), dtype=jnp.float32)
    out = jax.block_until_ready(hypernetwork1_forward(z, w1, b1))
    ref = _reference(z, w1, b1)
    assert out.shape == (N_CLASSES, HIDDEN_SIZE), out.shape
    assert jnp.allclose(out, ref, atol=1e-5, rtol=1e-5), "single-z mismatch vs reference"

    # --- batched path (B=8 -> 512 rows -> grid=(2,), parallel axis) ---
    B = 8
    zs = jax.random.normal(kzb, (B, Z_DIM), dtype=jnp.float32)
    outb = jax.block_until_ready(hypernetwork1_forward_batched(zs, w1, b1))
    refb = jnp.stack([_reference(zs[i], w1, b1) for i in range(B)])
    assert outb.shape == (B, N_CLASSES, HIDDEN_SIZE), outb.shape
    assert jnp.allclose(outb, refb, atol=1e-5, rtol=1e-5), "batched mismatch vs reference"

    print("KERNEL_OK")
</pallas_src>

<mosaic_0001>
module attributes {stable_mosaic.version = 11 : i64} {
  func.func @_hyper_kernel(%arg0: i32, %arg1: memref<64x8xf32, #tpu.memory_space<vmem>>, %arg2: memref<8x128xf32, #tpu.memory_space<vmem>>, %arg3: memref<1x128xf32, #tpu.memory_space<vmem>>, %arg4: memref<64x128xf32, #tpu.memory_space<vmem>>) attributes {dimension_semantics = [#tpu.dimension_semantics<parallel>], iteration_bounds = array<i64: 1>, scalar_prefetch = 0 : i64, scratch_operands = 0 : i64, tpu.core_type = #tpu.core_type<tc>, window_params = [{transform_indices = @transform_0, window_bounds = array<i64: 64, 8>}, {pipeline_mode = #tpu.pipeline_mode<synchronous>, transform_indices = @transform_1, window_bounds = array<i64: 8, 128>}, {pipeline_mode = #tpu.pipeline_mode<synchronous>, transform_indices = @transform_2, window_bounds = array<i64: 1, 128>}, {transform_indices = @transform_3, window_bounds = array<i64: 64, 128>}]} {
    %c0 = arith.constant 0 : index
    %c0_0 = arith.constant 0 : index
    %0 = vector.load %arg1[%c0, %c0_0] : memref<64x8xf32, #tpu.memory_space<vmem>>, vector<64x8xf32>
    %c0_1 = arith.constant 0 : index
    %c0_2 = arith.constant 0 : index
    %1 = vector.load %arg2[%c0_1, %c0_2] : memref<8x128xf32, #tpu.memory_space<vmem>>, vector<8x128xf32>
    %c0_3 = arith.constant 0 : index
    %c0_4 = arith.constant 0 : index
    %2 = vector.load %arg3[%c0_3, %c0_4] : memref<1x128xf32, #tpu.memory_space<vmem>>, vector<1x128xf32>
    %3 = vector.extract_strided_slice %0 {offsets = [0, 0], sizes = [64, 1], strides = [1, 1]} : vector<64x8xf32> to vector<64x1xf32>
    %4 = vector.extract_strided_slice %1 {offsets = [0, 0], sizes = [1, 128], strides = [1, 1]} : vector<8x128xf32> to vector<1x128xf32>
    %5 = vector.broadcast %3 : vector<64x1xf32> to vector<64x128xf32>
    %6 = vector.broadcast %4 : vector<1x128xf32> to vector<64x128xf32>
    %7 = arith.mulf %5, %6 : vector<64x128xf32>
    %8 = vector.broadcast %2 : vector<1x128xf32> to vector<64x128xf32>
    %9 = arith.addf %7, %8 : vector<64x128xf32>
    %10 = vector.extract_strided_slice %0 {offsets = [0, 1], sizes = [64, 1], strides = [1, 1]} : vector<64x8xf32> to vector<64x1xf32>
    %11 = vector.extract_strided_slice %1 {offsets = [1, 0], sizes = [1, 128], strides = [1, 1]} : vector<8x128xf32> to vector<1x128xf32>
    %12 = vector.broadcast %10 : vector<64x1xf32> to vector<64x128xf32>
    %13 = vector.broadcast %11 : vector<1x128xf32> to vector<64x128xf32>
    %14 = arith.mulf %12, %13 : vector<64x128xf32>
    %15 = arith.addf %9, %14 : vector<64x128xf32>
    %16 = vector.extract_strided_slice %0 {offsets = [0, 2], sizes = [64, 1], strides = [1, 1]} : vector<64x8xf32> to vector<64x1xf32>
    %17 = vector.extract_strided_slice %1 {offsets = [2, 0], sizes = [1, 128], strides = [1, 1]} : vector<8x128xf32> to vector<1x128xf32>
    %18 = vector.broadcast %16 : vector<64x1xf32> to vector<64x128xf32>
    %19 = vector.broadcast %17 : vector<1x128xf32> to vector<64x128xf32>
    %20 = arith.mulf %18, %19 : vector<64x128xf32>
    %21 = arith.addf %15, %20 : vector<64x128xf32>
    %22 = vector.extract_strided_slice %0 {offsets = [0, 3], sizes = [64, 1], strides = [1, 1]} : vector<64x8xf32> to vector<64x1xf32>
    %23 = vector.extract_strided_slice %1 {offsets = [3, 0], sizes = [1, 128], strides = [1, 1]} : vector<8x128xf32> to vector<1x128xf32>
    %24 = vector.broadcast %22 : vector<64x1xf32> to vector<64x128xf32>
    %25 = vector.broadcast %23 : vector<1x128xf32> to vector<64x128xf32>
    %26 = arith.mulf %24, %25 : vector<64x128xf32>
    %27 = arith.addf %21, %26 : vector<64x128xf32>
    %28 = vector.extract_strided_slice %0 {offsets = [0, 4], sizes = [64, 1], strides = [1, 1]} : vector<64x8xf32> to vector<64x1xf32>
    %29 = vector.extract_strided_slice %1 {offsets = [4, 0], sizes = [1, 128], strides = [1, 1]} : vector<8x128xf32> to vector<1x128xf32>
    %30 = vector.broadcast %28 : vector<64x1xf32> to vector<64x128xf32>
    %31 = vector.broadcast %29 : vector<1x128xf32> to vector<64x128xf32>
    %32 = arith.mulf %30, %31 : vector<64x128xf32>
    %33 = arith.addf %27, %32 : vector<64x128xf32>
    %34 = vector.extract_strided_slice %0 {offsets = [0, 5], sizes = [64, 1], strides = [1, 1]} : vector<64x8xf32> to vector<64x1xf32>
    %35 = vector.extract_strided_slice %1 {offsets = [5, 0], sizes = [1, 128], strides = [1, 1]} : vector<8x128xf32> to vector<1x128xf32>
    %36 = vector.broadcast %34 : vector<64x1xf32> to vector<64x128xf32>
    %37 = vector.broadcast %35 : vector<1x128xf32> to vector<64x128xf32>
    %38 = arith.mulf %36, %37 : vector<64x128xf32>
    %39 = arith.addf %33, %38 : vector<64x128xf32>
    %40 = vector.extract_strided_slice %0 {offsets = [0, 6], sizes = [64, 1], strides = [1, 1]} : vector<64x8xf32> to vector<64x1xf32>
    %41 = vector.extract_strided_slice %1 {offsets = [6, 0], sizes = [1, 128], strides = [1, 1]} : vector<8x128xf32> to vector<1x128xf32>
    %42 = vector.broadcast %40 : vector<64x1xf32> to vector<64x128xf32>
    %43 = vector.broadcast %41 : vector<1x128xf32> to vector<64x128xf32>
    %44 = arith.mulf %42, %43 : vector<64x128xf32>
    %45 = arith.addf %39, %44 : vector<64x128xf32>
    %46 = vector.extract_strided_slice %0 {offsets = [0, 7], sizes = [64, 1], strides = [1, 1]} : vector<64x8xf32> to vector<64x1xf32>
    %47 = vector.extract_strided_slice %1 {offsets = [7, 0], sizes = [1, 128], strides = [1, 1]} : vector<8x128xf32> to vector<1x128xf32>
    %48 = vector.broadcast %46 : vector<64x1xf32> to vector<64x128xf32>
    %49 = vector.broadcast %47 : vector<1x128xf32> to vector<64x128xf32>
    %50 = arith.mulf %48, %49 : vector<64x128xf32>
    %51 = arith.addf %45, %50 : vector<64x128xf32>
    %c0_5 = arith.constant 0 : index
    %c0_6 = arith.constant 0 : index
    %52 = vector.load %arg4[%c0_5, %c0_6] : memref<64x128xf32, #tpu.memory_space<vmem>>, vector<64x128xf32>
    tpu.vector_store %arg4[%c0_5, %c0_6], %51 {strides = array<i32>} : memref<64x128xf32, #tpu.memory_space<vmem>>, vector<64x128xf32>,
    return
  }
  func.func @transform_0(%arg0: i32) -> (i32, i32) {
    %c0_i32 = arith.constant 0 : i32
    %c0_i32_0 = arith.constant 0 : i32
    return %arg0, %c0_i32 : i32, i32
  }
  func.func @transform_1(%arg0: i32) -> (i32, i32) {
    %c0_i32 = arith.constant 0 : i32
    %c0_i32_0 = arith.constant 0 : i32
    %c0_i32_1 = arith.constant 0 : i32
    return %c0_i32, %c0_i32_0 : i32, i32
  }
  func.func @transform_2(%arg0: i32) -> (i32, i32) {
    %c0_i32 = arith.constant 0 : i32
    %c0_i32_0 = arith.constant 0 : i32
    %c0_i32_1 = arith.constant 0 : i32
    return %c0_i32, %c0_i32_0 : i32, i32
  }
  func.func @transform_3(%arg0: i32) -> (i32, i32) {
    %c0_i32 = arith.constant 0 : i32
    %c0_i32_0 = arith.constant 0 : i32
    return %arg0, %c0_i32 : i32, i32
  }
}

</mosaic_0001>

<bundles_post_ra>
// kernel: tpu_custom_call.1
= control target key start
LH: loop header
LB: loop body
LE: loop exit
PB: predicated region body
PF: predicated region fallthrough
CT: control target
= control target key end

     0   :  { %v529_v2 = vmov 0   ;;  %s797_s0 = inlined_call_operand.vmem [shape: f32[64,8], index: 0, kind: input, shape index: {}]   ;;  %s798_s1 = inlined_call_operand.vmem [shape: f32[8,128], index: 1, kind: input, shape index: {}]   ;;  %s799_s2 = inlined_call_operand.vmem [shape: f32[1,128], index: 2, kind: input, shape index: {}]   ;;  %s800_s3 = inlined_call_operand.hbm [shape: f32[64,128], index: 3, kind: output, shape index: {}]  }
   0x1   :  { %v563_v0 = vld [vmem:[%s797_s0 + $0x10] sm:$0xff]  ;;  %v568_v1 = vld [vmem:[%s797_s0] sm:$0xff]  ;;  %492 = vset.pattern.permute.xlu1 %v529_v2  ;;  %491 = vset.pattern.permute.xlu0 %v529_v2  ;;  %v575_v3 = vld [vmem:[%s797_s0 + $0x18] sm:$0xff] }
   0x2   :  { %37 = vperm.xlu1 %492, %v563_v0   ;;  %27 = vperm.xlu0 %491, %v568_v1   ;;  %v580_v4 = vld [vmem:[%s797_s0 + $0x8] sm:$0xff] }
   0x3   :  { %8 = vsyncpa [#allocation3], 0  ;;  %v587_v5 = vld [vmem:[%s797_s0 + $0x28] sm:$0xff]  ;;  %v592_v6 = vld [vmem:[%s797_s0 + $0x20] sm:$0xff]  ;;  %v530_v9 = vmov 1   ;;  %v531_v10 = vmov 2   ;;  %v65_v16 = vlaneseq }
   0x4   :  { %v599_v7 = vld [vmem:[%s797_s0 + $0x38] sm:$0xff]  ;;  %v604_v8 = vld [vmem:[%s797_s0 + $0x30] sm:$0xff]  ;;  %v532_v11 = vmov 3   ;;  %v533_v12 = vmov 4   ;;  %v534_v13 = vmov 5   ;;  %v535_v14 = vmov 6  }
   0x5   :  { %v536_v15 = vmov 7   ;;  %v659_v19 = vshrl.u32 %v65_v16, 7  ;;  %v666_v23 = vld [vmem:[%s798_s1] sm:$0xff] }
   0x6   :  { %42 = vperm.xlu1 %492, %v575_v3   ;;  %32 = vperm.xlu0 %491, %v580_v4   ;;  %v479_v33 = vld [vmem:[%s799_s2] ss:$0 sm:$0xff]  ;;  %s537_s2 = smov [#allocation2]  }
   0x7   :  { %v67_v22 = vsub.s32 0, %v659_v19  ;;  %v125_v27 = vsub.s32 1, %v659_v19  ;;  %v177_v62 = vsub.s32 2, %v659_v19  ;;  %s468_s30 = sshll.u32 %s537_s2, 4  ;;  %s469_s30 = int_to_ptr.vmem [resolvable:$true] %s468_s30 }
   0x8   :  { %s507_s4 = scalar_lea.vmem %s469_s30, 1024  ;;  %p512_p1 = scmp.lt.s32.totalorder %s469_s30, %s469_s30 }
   0x9   :  { %v68_v26 = vrot.slane %v666_v23, %v67_v22  ;;  %v126_v32 = vrot.slane %v666_v23, %v125_v27  ;;  %p508_p0 = scmp.ne.s32.totalorder %s469_s30, %s507_s4  ;;  %p513_p2 = scmp.lt.s32.totalorder %s507_s4, %s507_s4 }
   0xa   :  { %52 = vperm.xlu1 %492, %v587_v5   ;;  %47 = vperm.xlu0 %491, %v592_v6  }
   0xb   :  { %p514_p3 = por %p513_p2, %p512_p1 }
   0xd   :  { %p515_p4 = pnand %p514_p3, %p508_p0 }
   0xe   :  { %62 = vperm.xlu1 %492, %v599_v7   ;;  %57 = vperm.xlu0 %491, %v604_v8  }
  0x12   :  { %494 = vset.pattern.permute.xlu1 %v530_v9  ;;  %493 = vset.pattern.permute.xlu0 %v530_v9 }
  0x13   :  { %96 = vperm.xlu1 %494, %v580_v4   ;;  %92 = vperm.xlu0 %493, %v568_v1  }
  0x17   :  { %100 = vperm.xlu1 %494, %v563_v0   ;;  %104 = vperm.xlu0 %493, %v575_v3  }
  0x1b   :  { %108 = vperm.xlu1 %494, %v592_v6   ;;  %112 = vperm.xlu0 %493, %v587_v5  }
  0x1f   :  { %116 = vperm.xlu1 %494, %v604_v8   ;;  %120 = vperm.xlu0 %493, %v599_v7  }
  0x23   :  { %495 = vset.pattern.permute.xlu1 %v531_v10  ;;  %496 = vset.pattern.permute.xlu0 %v531_v10 }
  0x24   :  { %144 = vperm.xlu1 %495, %v568_v1   ;;  %148 = vperm.xlu0 %496, %v580_v4  }
  0x28   :  { %152 = vperm.xlu1 %495, %v563_v0   ;;  %160 = vperm.xlu0 %496, %v592_v6  }
  0x2c   :  { %156 = vperm.xlu1 %495, %v575_v3   ;;  %168 = vperm.xlu0 %496, %v604_v8  }
  0x30   :  { %164 = vperm.xlu1 %495, %v587_v5   ;;  %497 = vset.pattern.permute.xlu0 %v532_v11 }
  0x31   :  { %196 = vperm.xlu0 %497, %v568_v1  }
  0x34   :  { %172 = vperm.xlu1 %495, %v599_v7  }
  0x35   :  { %208 = vperm.xlu0 %497, %v575_v3  }
  0x38   :  { %498 = vset.pattern.permute.xlu1 %v532_v11 }
  0x39   :  { %200 = vperm.xlu1 %498, %v580_v4   ;;  %216 = vperm.xlu0 %497, %v587_v5  }
  0x3d   :  { %204 = vperm.xlu1 %498, %v563_v0   ;;  %224 = vperm.xlu0 %497, %v599_v7  }
  0x41   :  { %212 = vperm.xlu1 %498, %v592_v6   ;;  %500 = vset.pattern.permute.xlu0 %v533_v12 }
  0x42   :  { %252 = vperm.xlu0 %500, %v580_v4  }
  0x45   :  { %220 = vperm.xlu1 %498, %v604_v8  }
  0x46   :  { %264 = vperm.xlu0 %500, %v592_v6  }
  0x49   :  { %499 = vset.pattern.permute.xlu1 %v533_v12 }
  0x4a   :  { %248 = vperm.xlu1 %499, %v568_v1   ;;  %272 = vperm.xlu0 %500, %v604_v8  }
  0x4e   :  { %256 = vperm.xlu1 %499, %v563_v0   ;;  %501 = vset.pattern.permute.xlu0 %v534_v13 }
  0x4f   :  { %300 = vperm.xlu0 %501, %v568_v1  }
  0x52   :  { %260 = vperm.xlu1 %499, %v575_v3  }
  0x53   :  { %312 = vperm.xlu0 %501, %v575_v3  }
  0x56   :  { %268 = vperm.xlu1 %499, %v587_v5  }
  0x57   :  { %320 = vperm.xlu0 %501, %v587_v5  }
  0x5a   :  { %276 = vperm.xlu1 %499, %v599_v7  }
  0x5b   :  { %328 = vperm.xlu0 %501, %v599_v7  }
  0x5e   :  { %502 = vset.pattern.permute.xlu1 %v534_v13 }
  0x5f   :  { %304 = vperm.xlu1 %502, %v580_v4   ;;  %504 = vset.pattern.permute.xlu0 %v535_v14 }
  0x60   :  { %356 = vperm.xlu0 %504, %v580_v4  }
  0x63   :  { %308 = vperm.xlu1 %502, %v563_v0  }
  0x64   :  { %368 = vperm.xlu0 %504, %v592_v6  }
  0x67   :  { %316 = vperm.xlu1 %502, %v592_v6  }
  0x68   :  { %376 = vperm.xlu0 %504, %v604_v8  }
  0x6b   :  { %324 = vperm.xlu1 %502, %v604_v8  }
  0x6c   :  { %505 = vset.pattern.permute.xlu0 %v536_v15 }
  0x6d   :  { %404 = vperm.xlu0 %505, %v568_v1  }
  0x6f   :  { %503 = vset.pattern.permute.xlu1 %v535_v14 }
  0x70   :  { %352 = vperm.xlu1 %503, %v568_v1  }
  0x71   :  { %416 = vperm.xlu0 %505, %v575_v3  }
  0x74   :  { %360 = vperm.xlu1 %503, %v563_v0  }
  0x75   :  { %424 = vperm.xlu0 %505, %v587_v5  }
  0x78   :  { %364 = vperm.xlu1 %503, %v575_v3  }
  0x79   :  { %432 = vperm.xlu0 %505, %v599_v7  }
  0x7c   :  { %372 = vperm.xlu1 %503, %v587_v5  }
  0x7d   :  { %v38_v17 = vpop.permute.xlu1 %37  ;;  %v28_v18 = vpop.permute.xlu0 %27 }
  0x7e   :  { %v69_v28 = vmul.f32 %v68_v26, %v28_v18  ;;  %v71_v38 = vmul.f32 %v68_v26, %v38_v17 }
  0x80   :  { %380 = vperm.xlu1 %503, %v599_v7   ;;  %v83_v34 = vadd.f32 %v479_v33, %v69_v28  ;;  %v85_v48 = vadd.f32 %v479_v33, %v71_v38  ;;  %v178_v7 = vrot.slane %v666_v23, %v177_v62 }
  0x81   :  { %v43_v20 = vpop.permute.xlu1 %42  ;;  %v33_v21 = vpop.permute.xlu0 %32 }
  0x82   :  { %v70_v29 = vmul.f32 %v68_v26, %v33_v21  ;;  %v72_v39 = vmul.f32 %v68_v26, %v43_v20 }
  0x84   :  { %506 = vset.pattern.permute.xlu1 %v536_v15  ;;  %v84_v35 = vadd.f32 %v479_v33, %v70_v29  ;;  %v86_v49 = vadd.f32 %v479_v33, %v72_v39 }
  0x85   :  { %v53_v24 = vpop.permute.xlu1 %52  ;;  %408 = vperm.xlu1 %506, %v580_v4   ;;  %v48_v25 = vpop.permute.xlu0 %47 }
  0x86   :  { %v73_v42 = vmul.f32 %v68_v26, %v48_v25  ;;  %v74_v45 = vmul.f32 %v68_v26, %v53_v24 }
  0x88   :  { %v87_v52 = vadd.f32 %v479_v33, %v73_v42  ;;  %v88_v55 = vadd.f32 %v479_v33, %v74_v45 }
  0x89   :  { %v63_v30 = vpop.permute.xlu1 %62  ;;  %412 = vperm.xlu1 %506, %v563_v0   ;;  %v58_v31 = vpop.permute.xlu0 %57 }
  0x8a   :  { %v76_v58 = vmul.f32 %v68_v26, %v63_v30  ;;  %v75_v59 = vmul.f32 %v68_v26, %v58_v31 }
  0x8c   :  { %v90_v3 = vadd.f32 %v479_v33, %v76_v58  ;;  %v89_v4 = vadd.f32 %v479_v33, %v75_v59 }
  0x8d   :  { %420 = vperm.xlu1 %506, %v592_v6  }
  0x8e   :  { %v97_v36 = vpop.permute.xlu1 %96  ;;  %v93_v37 = vpop.permute.xlu0 %92 }
  0x8f   :  { %v128_v40 = vmul.f32 %v126_v32, %v97_v36  ;;  %v127_v41 = vmul.f32 %v126_v32, %v93_v37 }
  0x91   :  { %v136_v43 = vadd.f32 %v128_v40, %v84_v35  ;;  %v135_v44 = vadd.f32 %v127_v41, %v83_v34  ;;  %428 = vperm.xlu1 %506, %v604_v8   ;;  %v229_v34 = vsub.s32 3, %v659_v19 }
  0x92   :  { %v101_v46 = vpop.permute.xlu1 %100  ;;  %v105_v47 = vpop.permute.xlu0 %104 }
  0x93   :  { %v129_v50 = vmul.f32 %v126_v32, %v101_v46  ;;  %v130_v51 = vmul.f32 %v126_v32, %v105_v47  ;;  %v690_v39 = vrot.slane %v666_v23, %v229_v34 }
  0x95   :  { %v137_v53 = vadd.f32 %v129_v50, %v85_v48  ;;  %v138_v54 = vadd.f32 %v130_v51, %v86_v49 }
  0x96   :  { %v109_v56 = vpop.permute.xlu1 %108  ;;  %v113_v57 = vpop.permute.xlu0 %112 }
  0x97   :  { %v131_v60 = vmul.f32 %v126_v32, %v109_v56  ;;  %v132_v61 = vmul.f32 %v126_v32, %v113_v57 }
  0x99   :  { %v139_v63 = vadd.f32 %v131_v60, %v87_v52  ;;  %v140_v0 = vadd.f32 %v132_v61, %v88_v55 }
  0x9a   :  { %v117_v1 = vpop.permute.xlu1 %116  ;;  %v121_v2 = vpop.permute.xlu0 %120 }
  0x9b   :  { %v133_v5 = vmul.f32 %v126_v32, %v117_v1  ;;  %v134_v6 = vmul.f32 %v126_v32, %v121_v2 }
  0x9d   :  { %v141_v8 = vadd.f32 %v133_v5, %v89_v4  ;;  %v142_v9 = vadd.f32 %v134_v6, %v90_v3  ;;  %v281_v6 = vsub.s32 4, %v659_v19 }
  0x9f   :  { %v145_v10 = vpop.permute.xlu1 %144  ;;  %v149_v11 = vpop.permute.xlu0 %148 }
  0xa0   :  { %v179_v12 = vmul.f32 %v178_v7, %v145_v10  ;;  %v180_v13 = vmul.f32 %v178_v7, %v149_v11  ;;  %v726_v11 = vrot.slane %v666_v23, %v281_v6 }
  0xa2   :  { %v680_v14 = vadd.f32 %v179_v12, %v135_v44  ;;  %v188_v15 = vadd.f32 %v180_v13, %v136_v43  ;;  %v437_v13 = vsub.s32 7, %v659_v19 }
  0xa3   :  { %v153_v16 = vpop.permute.xlu1 %152  ;;  %v161_v17 = vpop.permute.xlu0 %160 }
  0xa4   :  { %v181_v18 = vmul.f32 %v178_v7, %v153_v16  ;;  %v183_v20 = vmul.f32 %v178_v7, %v161_v17  ;;  %v385_v16 = vsub.s32 6, %v659_v19 }
  0xa6   :  { %v189_v21 = vadd.f32 %v181_v18, %v137_v53  ;;  %v191_v22 = vadd.f32 %v183_v20, %v139_v63 }
  0xa7   :  { %v157_v24 = vpop.permute.xlu1 %156  ;;  %v169_v25 = vpop.permute.xlu0 %168 }
  0xa8   :  { %v182_v26 = vmul.f32 %v178_v7, %v157_v24  ;;  %v185_v27 = vmul.f32 %v178_v7, %v169_v25 }
  0xaa   :  { %v682_v28 = vadd.f32 %v182_v26, %v138_v54  ;;  %v193_v29 = vadd.f32 %v185_v27, %v141_v8  ;;  %v743_v26 = vrot.slane %v666_v23, %v385_v16 }
  0xab   :  { %v165_v30 = vpop.permute.xlu1 %164 }
  0xac   :  { %v184_v31 = vmul.f32 %v178_v7, %v165_v30  ;;  %v197_v32 = vpop.permute.xlu0 %196 }
  0xad   :  { %v231_v10 = vmul.f32 %v690_v39, %v197_v32 }
  0xae   :  { %v684_v33 = vadd.f32 %v184_v31, %v140_v0 }
  0xaf   :  { %v173_v35 = vpop.permute.xlu1 %172  ;;  %v239_v18 = vadd.f32 %v231_v10, %v680_v14 }
  0xb0   :  { %v186_v36 = vmul.f32 %v178_v7, %v173_v35  ;;  %v209_v37 = vpop.permute.xlu0 %208  ;;  %v333_v7 = vsub.s32 5, %v659_v19 }
  0xb1   :  { %v234_v24 = vmul.f32 %v690_v39, %v209_v37 }
  0xb2   :  { %v687_v38 = vadd.f32 %v186_v36, %v142_v9  ;;  %v729_v12 = vrot.slane %v666_v23, %v333_v7 }
  0xb3   :  { %v242_v34 = vadd.f32 %v234_v24, %v682_v28 }
  0xb4   :  { %v201_v40 = vpop.permute.xlu1 %200  ;;  %v217_v41 = vpop.permute.xlu0 %216 }
  0xb5   :  { %v232_v42 = vmul.f32 %v690_v39, %v201_v40  ;;  %v236_v31 = vmul.f32 %v690_v39, %v217_v41 }
  0xb7   :  { %v693_v43 = vadd.f32 %v232_v42, %v188_v15 }
  0xb8   :  { %v205_v44 = vpop.permute.xlu1 %204  ;;  %v225_v45 = vpop.permute.xlu0 %224 }
  0xb9   :  { %v233_v46 = vmul.f32 %v690_v39, %v205_v44  ;;  %v244_v44 = vadd.f32 %v236_v31, %v684_v33 }
  0xbb   :  { %v696_v47 = vadd.f32 %v233_v46, %v189_v21  ;;  %v739_v21 = vrot.slane %v666_v23, %v437_v13  ;;  %v238_v46 = vmul.f32 %v690_v39, %v225_v45 }
  0xbc   :  { %v213_v48 = vpop.permute.xlu1 %212 }
  0xbd   :  { %v235_v49 = vmul.f32 %v690_v39, %v213_v48  ;;  %v699_v50 = vpop.permute.xlu0 %252 }
  0xbe   :  { %v284_v33 = vmul.f32 %v726_v11, %v699_v50 }
  0xbf   :  { %v701_v51 = vadd.f32 %v235_v49, %v191_v22 }
  0xc0   :  { %v221_v52 = vpop.permute.xlu1 %220 }
  0xc1   :  { %v237_v53 = vmul.f32 %v690_v39, %v221_v52  ;;  %v704_v54 = vpop.permute.xlu0 %264 }
  0xc3   :  { %v706_v55 = vadd.f32 %v237_v53, %v193_v29 }
  0xc5   :  { %v249_v56 = vpop.permute.xlu1 %248  ;;  %v708_v57 = vpop.permute.xlu0 %272 }
  0xc6   :  { %v283_v15 = vmul.f32 %v726_v11, %v249_v56 }
  0xc8   :  { %v291_v25 = vadd.f32 %v283_v15, %v239_v18 }
  0xc9   :  { %v710_v58 = vpop.permute.xlu1 %256 }
  0xca   :  { %v301_v59 = vpop.permute.xlu0 %300  ;;  %v285_v50 = vmul.f32 %v726_v11, %v710_v58 }
  0xcb   :  { %v335_v20 = vmul.f32 %v729_v12, %v301_v59 }
  0xcc   :  { %v293_v58 = vadd.f32 %v285_v50, %v696_v47 }
  0xcd   :  { %v261_v60 = vpop.permute.xlu1 %260  ;;  %v343_v29 = vadd.f32 %v335_v20, %v291_v25 }
  0xce   :  { %v313_v61 = vpop.permute.xlu0 %312  ;;  %v286_v19 = vmul.f32 %v726_v11, %v261_v60  ;;  %v246_v60 = vadd.f32 %v238_v46, %v687_v38  ;;  %v292_v38 = vadd.f32 %v284_v33, %v693_v43 }
  0xcf   :  { %v338_v23 = vmul.f32 %v729_v12, %v313_v61 }
  0xd0   :  { %v294_v40 = vadd.f32 %v286_v19, %v242_v34 }
  0xd1   :  { %v269_v62 = vpop.permute.xlu1 %268 }
  0xd2   :  { %v321_v63 = vpop.permute.xlu0 %320  ;;  %v288_v36 = vmul.f32 %v726_v11, %v269_v62  ;;  %v346_v53 = vadd.f32 %v338_v23, %v294_v40 }
  0xd3   :  { %v340_v49 = vmul.f32 %v729_v12, %v321_v63 }
  0xd4   :  { %v296_v48 = vadd.f32 %v288_v36, %v244_v44 }
  0xd5   :  { %v277_v0 = vpop.permute.xlu1 %276 }
  0xd6   :  { %v329_v1 = vpop.permute.xlu0 %328  ;;  %v290_v28 = vmul.f32 %v726_v11, %v277_v0  ;;  %v348_v39 = vadd.f32 %v340_v49, %v296_v48 }
  0xd7   :  { %v342_v45 = vmul.f32 %v729_v12, %v329_v1 }
  0xd8   :  { %v298_v63 = vadd.f32 %v290_v28, %v246_v60 }
  0xda   :  { %v305_v2 = vpop.permute.xlu1 %304  ;;  %v350_v18 = vadd.f32 %v342_v45, %v298_v63 }
  0xdb   :  { %v712_v3 = vpop.permute.xlu0 %356  ;;  %v336_v10 = vmul.f32 %v729_v12, %v305_v2 }
  0xdc   :  { %v388_v25 = vmul.f32 %v743_v26, %v712_v3 }
  0xdd   :  { %v344_v24 = vadd.f32 %v336_v10, %v292_v38 }
  0xde   :  { %v714_v4 = vpop.permute.xlu1 %308 }
  0xdf   :  { %v716_v5 = vpop.permute.xlu0 %368  ;;  %v337_v43 = vmul.f32 %v729_v12, %v714_v4 }
  0xe0   :  { %v391_v47 = vmul.f32 %v743_v26, %v716_v5 }
  0xe1   :  { %v345_v34 = vadd.f32 %v337_v43, %v293_v58 }
  0xe2   :  { %v720_v8 = vpop.permute.xlu1 %316 }
  0xe3   :  { %v722_v9 = vpop.permute.xlu0 %376 }
  0xe6   :  { %v734_v17 = vpop.permute.xlu1 %324 }
  0xe8   :  { %v405_v22 = vpop.permute.xlu0 %404 }
  0xe9   :  { %v439_v14 = vmul.f32 %v739_v21, %v405_v22 }
  0xeb   :  { %v353_v27 = vpop.permute.xlu1 %352 }
  0xec   :  { %v387_v30 = vmul.f32 %v743_v26, %v353_v27  ;;  %v417_v32 = vpop.permute.xlu0 %416  ;;  %v287_v27 = vmul.f32 %v726_v11, %v704_v54  ;;  %v289_v54 = vmul.f32 %v726_v11, %v708_v57  ;;  %v393_v11 = vmul.f32 %v743_v26, %v722_v9 }
  0xed   :  { %v442_v59 = vmul.f32 %v739_v21, %v417_v32 }
  0xee   :  { %v395_v35 = vadd.f32 %v387_v30, %v343_v29  ;;  %v396_v30 = vadd.f32 %v388_v25, %v344_v24  ;;  %v295_v32 = vadd.f32 %v287_v27, %v701_v51  ;;  %v297_v23 = vadd.f32 %v289_v54, %v706_v55 }
  0xef   :  { %v361_v37 = vpop.permute.xlu1 %360 }
  0xf0   :  { %v447_v42 = vadd.f32 %v439_v14, %v395_v35  ;;  %v425_v52 = vpop.permute.xlu0 %424  ;;  %v339_v14 = vmul.f32 %v729_v12, %v720_v8  ;;  %v389_v31 = vmul.f32 %v743_v26, %v361_v37  ;;  %v341_v8 = vmul.f32 %v729_v12, %v734_v17 }
  0xf1   :  { %v444_v0 = vmul.f32 %v739_v21, %v425_v52 }
  0xf2   :  { %455 = vst [vmem:[#allocation2] sm:$0xff] %v447_v42  ;;  %v347_v36 = vadd.f32 %v339_v14, %v295_v32  ;;  %v397_v40 = vadd.f32 %v389_v31, %v345_v34  ;;  %v349_v57 = vadd.f32 %v341_v8, %v297_v23 }
  0xf3   :  { %v365_v41 = vpop.permute.xlu1 %364 }
  0xf4   :  { %v390_v56 = vmul.f32 %v743_v26, %v365_v41  ;;  %v433_v13 = vpop.permute.xlu0 %432  ;;  %v399_v44 = vadd.f32 %v391_v47, %v347_v36  ;;  %v401_v17 = vadd.f32 %v393_v11, %v349_v57 }
  0xf5   :  { %v446_v22 = vmul.f32 %v739_v21, %v433_v13 }
  0xf6   :  { %v398_v61 = vadd.f32 %v390_v56, %v346_v53 }
  0xf7   :  { %v373_v62 = vpop.permute.xlu1 %372 }
  0xf8   :  { %v450_v6 = vadd.f32 %v442_v59, %v398_v61  ;;  %v392_v7 = vmul.f32 %v743_v26, %v373_v62 }
  0xfa   :  { %458 = vst [vmem:[#allocation2 + $0x18] sm:$0xff] %v450_v6  ;;  %v400_v15 = vadd.f32 %v392_v7, %v348_v39 }
  0xfb   :  { %v381_v16 = vpop.permute.xlu1 %380 }
  0xfc   :  { %v452_v1 = vadd.f32 %v444_v0, %v400_v15  ;;  %v394_v20 = vmul.f32 %v743_v26, %v381_v16 }
  0xfe   :  { %460 = vst [vmem:[#allocation2 + $0x28] sm:$0xff] %v452_v1  ;;  %v402_v2 = vadd.f32 %v394_v20, %v350_v18 }
 0x100   :  { %v454_v29 = vadd.f32 %v446_v22, %v402_v2  ;;  %v409_v19 = vpop.permute.xlu1 %408 }
 0x101   :  { %v440_v3 = vmul.f32 %v739_v21, %v409_v19 }
 0x102   :  { %462 = vst [vmem:[#allocation2 + $0x38] sm:$0xff] %v454_v29 }
 0x103   :  { %v448_v4 = vadd.f32 %v440_v3, %v396_v30 }
 0x104   :  { %v413_v35 = vpop.permute.xlu1 %412 }
 0x105   :  { %456 = vst [vmem:[#allocation2 + $0x8] sm:$0xff] %v448_v4  ;;  %v441_v37 = vmul.f32 %v739_v21, %v413_v35 }
 0x107   :  { %v449_v51 = vadd.f32 %v441_v37, %v397_v40 }
 0x108   :  { %v421_v42 = vpop.permute.xlu1 %420 }
 0x109   :  { %457 = vst [vmem:[#allocation2 + $0x10] sm:$0xff] %v449_v51  ;;  %v443_v5 = vmul.f32 %v739_v21, %v421_v42 }
 0x10b   :  { %v451_v46 = vadd.f32 %v443_v5, %v399_v44 }
 0x10c   :  { %v429_v12 = vpop.permute.xlu1 %428 }
 0x10d   :  { %459 = vst [vmem:[#allocation2 + $0x20] sm:$0xff] %v451_v46  ;;  %v445_v48 = vmul.f32 %v739_v21, %v429_v12 }
 0x10f   :  { %v453_v55 = vadd.f32 %v445_v48, %v401_v17 }
 0x111   :  { %461 = vst [vmem:[#allocation2 + $0x30] sm:$0xff] %v453_v55 }
 0x112   :  { %518 = shalt.err (!%p515_p4)
}
 0x113   :  { %s538_s5 = smov 128   ;;  %s539_s6 = smov 8  }
 0x114   :  { %474 = dma.vmem_to_hbm [thread:$0]  %s469_s30, 1024, %s800_s3, [#allocation3], %s538_s5, %s538_s5, %s539_s6  }
 0x115   :  { %527 = dma.done.wait [#allocation3], 1024  }
 0x116   :  { %528 = vsyncadd [#allocation3], 4294966272 }
 0x117   :  { %478 = vsyncpa [#allocation3], 1 }

</bundles_post_ra>
